<compile_context>
chip_gen: v7x
topology: tpu7x:2x2x1
jax: 0.10.0
libtpu: 0.0.40
codegen_flags: <defaults>
</compile_context>

<pallas_src>
import jax
import jax.numpy as jnp
from jax.experimental import pallas as pl
from jax.experimental.pallas import tpu as pltpu


def _affine_kernel(x_ref, a_ref, c_ref, o_ref):
    # (bt, 752) @ (752, 2) + (1, 2)  — one MXU matmul, K = 752.
    o_ref[...] = (
        jnp.dot(x_ref[...], a_ref[...], preferred_element_type=jnp.float32)
        + c_ref[...]
    )


def _round_up(n, m):
    return ((n + m - 1) // m) * m


def _fold_decoder_affine(params):
    """Fold the entire (purely linear) decoder into A^T (752, 2) and c (1, 2)."""
    w1, b1 = params["w1"], params["b1"]   # (64, 16), (64,)
    w2, b2 = params["w2"], params["b2"]   # (64, 64)
    w3, b3 = params["w3"], params["b3"]   # (32, 64)
    w4, b4 = params["w4"], params["b4"]   # (32, 32)
    w5, b5 = params["w5"], params["b5"]   # (16, 32)
    w6, b6 = params["w6"], params["b6"]   # (16, 16)
    w7, b7 = params["w7"], params["b7"]   # (8, 16)
    w8, b8 = params["w8"], params["b8"]   # (1, 8)
    wfc, bfc = params["wfc"], params["bfc"]  # (2, 6000), (2,)

    def pair_sum(m):  # fold an exact x2 nearest upsample backwards
        return m.reshape(m.shape[0], m.shape[1], -1, 2).sum(axis=-1)

    # conv6 -> conv7 -> conv8 compose into one 16 -> 1 pointwise conv.
    w678 = w8 @ w7 @ w6                              # (1, 16)
    b678 = (w8 @ (w7 @ b6 + b7) + b8)[0]             # scalar

    bias = bfc + b678 * wfc.sum(axis=1)              # (2,)

    # fc over L = 6000; Upsample 1500 -> 6000 is an exact x4 repeat.
    m = wfc.reshape(2, 1500, 4).sum(axis=-1)         # (2, 1500)
    m = m[:, None, :] * w678[0][None, :, None]       # (2, 16, 1500)  coeff of conv5 out
    # conv5 (32 -> 16) preceded by Upsample 750 -> 1500.
    bias = bias + jnp.einsum("jcl,c->j", m, b5)
    m = pair_sum(jnp.einsum("jcl,cd->jdl", m, w5))   # (2, 32, 750)   coeff of conv4 out
    # conv4 (32 -> 32) preceded by Upsample 376 -> 752 and the [1:-1] crop.
    bias = bias + jnp.einsum("jcl,c->j", m, b4)
    m = jnp.einsum("jcl,cd->jdl", m, w4)             # (2, 32, 750)
    m = pair_sum(jnp.pad(m, ((0, 0), (0, 0), (1, 1))))  # crop -> zero edges; (2, 32, 376)
    # conv3 (64 -> 32) preceded by Upsample 188 -> 376.
    bias = bias + jnp.einsum("jcl,c->j", m, b3)
    m = pair_sum(jnp.einsum("jcl,cd->jdl", m, w3))   # (2, 64, 188)
    # conv2 (64 -> 64) preceded by Upsample 94 -> 188.
    bias = bias + jnp.einsum("jcl,c->j", m, b2)
    m = pair_sum(jnp.einsum("jcl,cd->jdl", m, w2))   # (2, 64, 94)
    # conv1 (16 -> 64) preceded by Upsample 47 -> 94.
    bias = bias + jnp.einsum("jcl,c->j", m, b1)
    m = pair_sum(jnp.einsum("jcl,cd->jdl", m, w1))   # (2, 16, 47)  coeff of x.permute(0,2,1)

    # x.permute(0, 2, 1)[b, c, t] == x[b, t, c]; flatten x[b] row-major over (t, c).
    a_t = jnp.transpose(m, (2, 1, 0)).reshape(47 * 16, 2)   # (752, 2)
    return a_t.astype(jnp.float32), bias.reshape(1, 2).astype(jnp.float32)


def eq_transformer_decoder(x, params, *, batch_tile=None):
    """x: (B, 47, 16) float32  ->  (B, 2, 1) float32 (same as the PyTorch forward)."""
    B, L_in, C_in = x.shape
    assert (L_in, C_in) == (47, 16), "decoder is defined for (B, 47, 16) inputs"
    K = L_in * C_in  # 752

    a_t, c_row = _fold_decoder_affine(params)       # (752, 2), (1, 2)

    # Flatten per-example input; row-major (t, c) matches the fold above.
    x_flat = x.reshape(B, K)

    # Batch tile on sublanes.  Pad B up instead of requiring divisibility;
    # small batches become a single grid step (no per-step overhead blow-up).
    if batch_tile is None:
        bt = min(_round_up(B, 8), 1024)
    else:
        bt = _round_up(int(batch_tile), 8)
    B_pad = _round_up(B, bt)
    if B_pad != B:
        x_flat = jnp.pad(x_flat, ((0, B_pad - B), (0, 0)))
    G = B_pad // bt

    out = pl.pallas_call(
        _affine_kernel,
        out_shape=jax.ShapeDtypeStruct((B_pad, 2), jnp.float32),
        grid_spec=pltpu.PrefetchScalarGridSpec(
            num_scalar_prefetch=0,
            grid=(G,),
            in_specs=[
                pl.BlockSpec((bt, K), lambda g: (g, 0)),   # activations (batch tile)
                pl.BlockSpec((K, 2), lambda g: (0, 0)),    # folded weight A^T (6 KB)
                pl.BlockSpec((1, 2), lambda g: (0, 0)),    # folded bias
            ],
            out_specs=pl.BlockSpec((bt, 2), lambda g: (g, 0)),
        ),
        compiler_params=pltpu.CompilerParams(
            dimension_semantics=("parallel",),
        ),
    )(x_flat, a_t, c_row)

    # (B_pad, 2) -> (B, 2, 1)  (matches fc(...).permute(0, 2, 1) in PyTorch)
    return out[:B, :, None]


def init_params(key):
    """Deterministic synthetic weights, PyTorch-default-style uniform init."""
    conv_dims = [(64, 16), (64, 64), (32, 64), (32, 32),
                 (16, 32), (16, 16), (8, 16), (1, 8)]
    keys = jax.random.split(key, 2 * len(conv_dims) + 2)
    params = {}
    for i, (co, ci) in enumerate(conv_dims):
        bound = 1.0 / (ci ** 0.5)
        params[f"w{i + 1}"] = jax.random.uniform(keys[2 * i], (co, ci), jnp.float32, -bound, bound)
        params[f"b{i + 1}"] = jax.random.uniform(keys[2 * i + 1], (co,), jnp.float32, -bound, bound)
    bound = 1.0 / (6000.0 ** 0.5)
    params["wfc"] = jax.random.uniform(keys[-2], (2, 6000), jnp.float32, -bound, bound)
    params["bfc"] = jax.random.uniform(keys[-1], (2,), jnp.float32, -bound, bound)
    return params


def reference_forward(x, params):
    """Pure-JAX reference with explicit nearest upsampling (mirrors the PyTorch code)."""
    h = jnp.transpose(x, (0, 2, 1))

    def up(t, size):
        l_in = t.shape[-1]
        src = jnp.floor(jnp.arange(size, dtype=jnp.float32) * (float(l_in) / float(size))).astype(jnp.int32)
        return t[..., src]

    def conv(t, w, b):
        return jnp.einsum("oc,bcl->bol", w, t) + b[None, :, None]

    h = conv(up(h, 94), params["w1"], params["b1"])
    h = conv(up(h, 188), params["w2"], params["b2"])
    h = conv(up(h, 376), params["w3"], params["b3"])
    h = conv(up(h, 752)[:, :, 1:-1], params["w4"], params["b4"])
    h = conv(up(h, 1500), params["w5"], params["b5"])
    h = conv(up(h, 6000), params["w6"], params["b6"])
    h = conv(h, params["w7"], params["b7"])
    h = conv(h, params["w8"], params["b8"])
    h = jnp.einsum("bcl,jl->bcj", h, params["wfc"]) + params["bfc"][None, None, :]
    return jnp.transpose(h, (0, 2, 1))


if __name__ == "__main__":
    key = jax.random.PRNGKey(0)
    pkey, xkey = jax.random.split(key)
    params = init_params(pkey)

    B, L_in, C_in = 2, 47, 16
    x = jax.random.normal(xkey, (B, L_in, C_in), dtype=jnp.float32)

    out = jax.jit(eq_transformer_decoder)(x, params)
    out = jax.block_until_ready(out)

    assert out.shape == (B, 2, 1), out.shape
    ref = reference_forward(x, params)
    assert jnp.allclose(out, ref, rtol=1e-3, atol=1e-4), (out, ref)
    print("KERNEL_OK")
</pallas_src>

<mosaic_0001>
module attributes {stable_mosaic.version = 11 : i64} {
  func.func @_affine_kernel(%arg0: i32, %arg1: memref<8x752xf32, #tpu.memory_space<vmem>>, %arg2: memref<752x2xf32, #tpu.memory_space<vmem>>, %arg3: memref<1x2xf32, #tpu.memory_space<vmem>>, %arg4: memref<8x2xf32, #tpu.memory_space<vmem>>) attributes {dimension_semantics = [#tpu.dimension_semantics<parallel>], iteration_bounds = array<i64: 1>, scalar_prefetch = 0 : i64, scratch_operands = 0 : i64, tpu.core_type = #tpu.core_type<tc>, window_params = [{transform_indices = @transform_0, window_bounds = array<i64: 8, 752>}, {pipeline_mode = #tpu.pipeline_mode<synchronous>, transform_indices = @transform_1, window_bounds = array<i64: 752, 2>}, {pipeline_mode = #tpu.pipeline_mode<synchronous>, transform_indices = @transform_2, window_bounds = array<i64: 1, 2>}, {transform_indices = @transform_3, window_bounds = array<i64: 8, 2>}]} {
    %c0 = arith.constant 0 : index
    %c0_0 = arith.constant 0 : index
    %0 = vector.load %arg1[%c0, %c0_0] : memref<8x752xf32, #tpu.memory_space<vmem>>, vector<8x752xf32>
    %c0_1 = arith.constant 0 : index
    %c0_2 = arith.constant 0 : index
    %1 = vector.load %arg2[%c0_1, %c0_2] : memref<752x2xf32, #tpu.memory_space<vmem>>, vector<752x2xf32>
    %cst = arith.constant dense<0.000000e+00> : vector<8x2xf32>
    %2 = tpu.matmul %0, %1, %cst {dimension_numbers = #tpu.dot_dimension_numbers<[1], [0], [0], [1], [0, 0, 1, 1], [], []>} : vector<8x752xf32>, vector<752x2xf32>, vector<8x2xf32> -> vector<8x2xf32>
    %c0_3 = arith.constant 0 : index
    %c0_4 = arith.constant 0 : index
    %3 = vector.load %arg3[%c0_3, %c0_4] : memref<1x2xf32, #tpu.memory_space<vmem>>, vector<1x2xf32>
    %4 = vector.broadcast %3 : vector<1x2xf32> to vector<8x2xf32>
    %5 = arith.addf %2, %4 : vector<8x2xf32>
    %c0_5 = arith.constant 0 : index
    %c0_6 = arith.constant 0 : index
    %6 = vector.load %arg4[%c0_5, %c0_6] : memref<8x2xf32, #tpu.memory_space<vmem>>, vector<8x2xf32>
    tpu.vector_store %arg4[%c0_5, %c0_6], %5 {strides = array<i32>} : memref<8x2xf32, #tpu.memory_space<vmem>>, vector<8x2xf32>,
    return
  }
  func.func @transform_0(%arg0: i32) -> (i32, i32) {
    %c0_i32 = arith.constant 0 : i32
    %c0_i32_0 = arith.constant 0 : i32
    return %arg0, %c0_i32 : i32, i32
  }
  func.func @transform_1(%arg0: i32) -> (i32, i32) {
    %c0_i32 = arith.constant 0 : i32
    %c0_i32_0 = arith.constant 0 : i32
    %c0_i32_1 = arith.constant 0 : i32
    return %c0_i32, %c0_i32_0 : i32, i32
  }
  func.func @transform_2(%arg0: i32) -> (i32, i32) {
    %c0_i32 = arith.constant 0 : i32
    %c0_i32_0 = arith.constant 0 : i32
    %c0_i32_1 = arith.constant 0 : i32
    return %c0_i32, %c0_i32_0 : i32, i32
  }
  func.func @transform_3(%arg0: i32) -> (i32, i32) {
    %c0_i32 = arith.constant 0 : i32
    %c0_i32_0 = arith.constant 0 : i32
    return %arg0, %c0_i32 : i32, i32
  }
}

</mosaic_0001>

<bundles_post_ra>
// kernel: eq_transformer_decoder.1
= control target key start
LH: loop header
LB: loop body
LE: loop exit
PB: predicated region body
PF: predicated region fallthrough
CT: control target
= control target key end

     0   :  { %v523_v3 = vmov 0.0|0.0   ;;  %vm121_vm0 = vcmask 916480   ;;  %vm335_vm1 = vcmask 15360   ;;  %s865_s1 = inlined_call_operand.vmem [shape: f32[752,2], index: 1, kind: input, shape index: {}]   ;;  %s866_s0 = inlined_call_operand.vmem [shape: f32[8,752], index: 0, kind: input, shape index: {}]   ;;  %s867_s2 = inlined_call_operand.vmem [shape: f32[1,2], index: 2, kind: input, shape index: {}]   ;;  %s868_s3 = inlined_call_operand.vmem [shape: f32[8,2], index: 3, kind: output, shape index: {}]  }
   0x1   :  { %v36_v0 = vld [vmem:[%s865_s1 + $0x80] sm:$0xff]  ;;  %v37_v1 = vld [vmem:[%s865_s1 + $0x88] sm:$0xff]  ;;  %477 = vmatprep.subr.bf16.mxu0 %v523_v3  ;;  %v38_v6 = vld [vmem:[%s865_s1 + $0x90] sm:$0xff] }
   0x2   :  { %v20_v2 = vld [vmem:[%s865_s1] sm:$0xff]  ;;  %v413_v4 = vpack.c.bf16 %v37_v1, %v36_v0  ;;  %v21_v5 = vld [vmem:[%s865_s1 + $0x8] sm:$0xff]  ;;  %v39_v7 = vld [vmem:[%s865_s1 + $0x98] sm:$0xff] }
   0x3   :  { %v415_v8 = vpack.c.bf16 %v21_v5, %v20_v2  ;;  %v417_v9 = vpack.c.bf16 %v39_v7, %v38_v6  ;;  %v22_v10 = vld [vmem:[%s865_s1 + $0x10] sm:$0xff]  ;;  %v23_v11 = vld [vmem:[%s865_s1 + $0x18] sm:$0xff]  ;;  %v40_v12 = vld [vmem:[%s865_s1 + $0xa0] sm:$0xff] }
   0x4   :  { %414 = vmatprep.subr.bf16.mxu1 %v413_v4  ;;  %v41_v13 = vld [vmem:[%s865_s1 + $0xa8] sm:$0xff]  ;;  %v419_v14 = vpack.c.bf16 %v23_v11, %v22_v10  ;;  %v84_v15 = vld [vmem:[%s865_s1 + $0x200] sm:$0xff]  ;;  %v42_v21 = vld [vmem:[%s865_s1 + $0xb0] sm:$0xff] }
   0x5   :  { %416 = vmatpush3.bf16.msra.mxu1 %v415_v8  ;;  %v85_v16 = vld [vmem:[%s865_s1 + $0x208] sm:$0xff]  ;;  %v421_v17 = vpack.c.bf16 %v41_v13, %v40_v12  ;;  %v24_v18 = vld [vmem:[%s865_s1 + $0x20] sm:$0xff]  ;;  %v43_v22 = vld [vmem:[%s865_s1 + $0xb8] sm:$0xff] }
   0x6   :  { %418 = vmatprep.subr.bf16.mxu1 %v417_v9  ;;  %v25_v19 = vld [vmem:[%s865_s1 + $0x28] sm:$0xff]  ;;  %v478_v20 = vpack.c.bf16 %v85_v16, %v84_v15  ;;  %v86_v23 = vld [vmem:[%s865_s1 + $0x210] sm:$0xff]  ;;  %v87_v24 = vld [vmem:[%s865_s1 + $0x218] sm:$0xff]  ;;  %v425_v29 = vpack.c.bf16 %v43_v22, %v42_v21 }
   0x7   :  { %v481_v25 = vpack.c.bf16 %v87_v24, %v86_v23  ;;  %v423_v26 = vpack.c.bf16 %v25_v19, %v24_v18  ;;  %v88_v27 = vld [vmem:[%s865_s1 + $0x220] sm:$0xff]  ;;  %v89_v28 = vld [vmem:[%s865_s1 + $0x228] sm:$0xff]  ;;  %v26_v30 = vld [vmem:[%s865_s1 + $0x30] sm:$0xff] }
   0x8   :  { %479 = vmatpush1.bf16.msra.mxu0 %v478_v20  ;;  %v27_v31 = vld [vmem:[%s865_s1 + $0x38] sm:$0xff]  ;;  %v44_v32 = vld [vmem:[%s865_s1 + $0xc0] sm:$0xff]  ;;  %v45_v33 = vld [vmem:[%s865_s1 + $0xc8] sm:$0xff]  ;;  %v484_v34 = vpack.c.bf16 %v89_v28, %v88_v27 }
   0x9   :  { %420 = vmatpush3.bf16.msra.mxu1 %v419_v14  ;;  %480 = vmatprep.subr.bf16.mxu0 %v523_v3  ;;  %v427_v35 = vpack.c.bf16 %v27_v31, %v26_v30  ;;  %v90_v36 = vld [vmem:[%s865_s1 + $0x230] sm:$0xff]  ;;  %v91_v37 = vld [vmem:[%s865_s1 + $0x238] sm:$0xff]  ;;  %v429_v38 = vpack.c.bf16 %v45_v33, %v44_v32  ;;  %v28_v39 = vld [vmem:[%s865_s1 + $0x40] sm:$0xff] }
   0xa   :  { %422 = vmatprep.subr.bf16.mxu1 %v421_v17  ;;  %v29_v40 = vld [vmem:[%s865_s1 + $0x48] sm:$0xff]  ;;  %v46_v41 = vld [vmem:[%s865_s1 + $0xd0] sm:$0xff]  ;;  %v47_v42 = vld [vmem:[%s865_s1 + $0xd8] sm:$0xff]  ;;  %v487_v44 = vpack.c.bf16 %v91_v37, %v90_v36 }
   0xb   :  { %v15_v43 = vld [vmem:[%s866_s0 + $0x8] sm:$0xff]  ;;  %v431_v45 = vpack.c.bf16 %v29_v40, %v28_v39  ;;  %v92_v46 = vld [vmem:[%s865_s1 + $0x240] sm:$0xff]  ;;  %v433_v48 = vpack.c.bf16 %v47_v42, %v46_v41  ;;  %v30_v49 = vld [vmem:[%s865_s1 + $0x50] sm:$0xff] }
   0xc   :  { %482 = vmatpush1.bf16.msra.mxu0 %v481_v25  ;;  %189 = vmatprep.mubr.f32.mxu1 %v15_v43  ;;  %v93_v47 = vld [vmem:[%s865_s1 + $0x248] sm:$0xff]  ;;  %v31_v50 = vld [vmem:[%s865_s1 + $0x58] sm:$0xff]  ;;  %v48_v51 = vld [vmem:[%s865_s1 + $0xe0] sm:$0xff] }
   0xd   :  { %424 = vmatpush3.bf16.msra.mxu1 %v423_v26  ;;  %483 = vmatprep.subr.bf16.mxu0 %v523_v3  ;;  %v49_v52 = vld [vmem:[%s865_s1 + $0xe8] sm:$0xff]  ;;  %v490_v53 = vpack.c.bf16 %v93_v47, %v92_v46  ;;  %v435_v54 = vpack.c.bf16 %v31_v50, %v30_v49  ;;  %v94_v55 = vld [vmem:[%s865_s1 + $0x250] sm:$0xff]  ;;  %v95_v56 = vld [vmem:[%s865_s1 + $0x258] sm:$0xff] }
   0xe   :  { %426 = vmatprep.subr.bf16.mxu1 %v425_v29  ;;  %v437_v57 = vpack.c.bf16 %v49_v52, %v48_v51  ;;  %v32_v58 = vld [vmem:[%s865_s1 + $0x60] sm:$0xff]  ;;  %v33_v59 = vld [vmem:[%s865_s1 + $0x68] sm:$0xff]  ;;  %v50_v60 = vld [vmem:[%s865_s1 + $0xf0] sm:$0xff]  ;;  %v493_v62 = vpack.c.bf16 %v95_v56, %v94_v55 }
   0xf   :  { %v51_v61 = vld [vmem:[%s865_s1 + $0xf8] sm:$0xff]  ;;  %v439_v63 = vpack.c.bf16 %v33_v59, %v32_v58  ;;  %v96_v0 = vld [vmem:[%s865_s1 + $0x260] sm:$0xff]  ;;  %v97_v1 = vld [vmem:[%s865_s1 + $0x268] sm:$0xff] }
  0x10   :  { %485 = vmatpush1.bf16.msra.mxu0 %v484_v34  ;;  %v441_v2 = vpack.c.bf16 %v51_v61, %v50_v60  ;;  %v34_v4 = vld [vmem:[%s865_s1 + $0x70] sm:$0xff]  ;;  %v35_v5 = vld [vmem:[%s865_s1 + $0x78] sm:$0xff]  ;;  %v68_v6 = vld [vmem:[%s865_s1 + $0x180] sm:$0xff]  ;;  %v496_v8 = vpack.c.bf16 %v97_v1, %v96_v0 }
  0x11   :  { %428 = vmatpush3.bf16.msra.mxu1 %v427_v35  ;;  %486 = vmatprep.subr.bf16.mxu0 %v523_v3  ;;  %v69_v7 = vld [vmem:[%s865_s1 + $0x188] sm:$0xff]  ;;  %v443_v9 = vpack.c.bf16 %v35_v5, %v34_v4  ;;  %v98_v10 = vld [vmem:[%s865_s1 + $0x270] sm:$0xff]  ;;  %v99_v11 = vld [vmem:[%s865_s1 + $0x278] sm:$0xff] }
  0x12   :  { %430 = vmatprep.subr.bf16.mxu1 %v429_v38  ;;  %v445_v12 = vpack.c.bf16 %v69_v7, %v68_v6  ;;  %v52_v13 = vld [vmem:[%s865_s1 + $0x100] sm:$0xff]  ;;  %v53_v14 = vld [vmem:[%s865_s1 + $0x108] sm:$0xff]  ;;  %v70_v15 = vld [vmem:[%s865_s1 + $0x190] sm:$0xff]  ;;  %v499_v18 = vpack.c.bf16 %v99_v11, %v98_v10 }
  0x13   :  { %v71_v16 = vld [vmem:[%s865_s1 + $0x198] sm:$0xff]  ;;  %v14_v17 = vld [vmem:[%s866_s0] sm:$0xff]  ;;  %v447_v19 = vpack.c.bf16 %v53_v14, %v52_v13  ;;  %v101_v21 = vld [vmem:[%s865_s1 + $0x288] sm:$0xff] }
  0x14   :  { %488 = vmatpush1.bf16.msra.mxu0 %v487_v44  ;;  %v100_v20 = vld [vmem:[%s865_s1 + $0x280] sm:$0xff]  ;;  %v19_v22 = vld [vmem:[%s866_s0 + $0x28] sm:$0xff]  ;;  %v449_v23 = vpack.c.bf16 %v71_v16, %v70_v15  ;;  %v54_v24 = vld [vmem:[%s865_s1 + $0x110] sm:$0xff] }
  0x15   :  { %432 = vmatpush3.bf16.msra.mxu1 %v431_v45  ;;  %489 = vmatprep.subr.bf16.mxu0 %v523_v3  ;;  %v55_v25 = vld [vmem:[%s865_s1 + $0x118] sm:$0xff]  ;;  %v72_v26 = vld [vmem:[%s865_s1 + $0x1a0] sm:$0xff]  ;;  %v73_v27 = vld [vmem:[%s865_s1 + $0x1a8] sm:$0xff]  ;;  %v502_v29 = vpack.c.bf16 %v101_v21, %v100_v20 }
  0x16   :  { %434 = vmatprep.subr.bf16.mxu1 %v433_v48  ;;  %342 = vmatprep.mubr.msk.f32.mxu0 %vm121_vm0, %v19_v22  ;;  %v17_v28 = vld [vmem:[%s866_s0 + $0x18] sm:$0xff]  ;;  %v451_v30 = vpack.c.bf16 %v55_v25, %v54_v24  ;;  %v102_v31 = vld [vmem:[%s865_s1 + $0x290] sm:$0xff]  ;;  %v453_v33 = vpack.c.bf16 %v73_v27, %v72_v26  ;;  %v56_v34 = vld [vmem:[%s865_s1 + $0x120] sm:$0xff] }
  0x17   :  { %v103_v32 = vld [vmem:[%s865_s1 + $0x298] sm:$0xff]  ;;  %v57_v35 = vld [vmem:[%s865_s1 + $0x128] sm:$0xff]  ;;  %v74_v36 = vld [vmem:[%s865_s1 + $0x1b0] sm:$0xff] }
  0x18   :  { %491 = vmatpush1.bf16.msra.mxu0 %v490_v53  ;;  %v75_v37 = vld [vmem:[%s865_s1 + $0x1b8] sm:$0xff]  ;;  %v505_v38 = vpack.c.bf16 %v103_v32, %v102_v31  ;;  %v455_v39 = vpack.c.bf16 %v57_v35, %v56_v34  ;;  %v104_v40 = vld [vmem:[%s865_s1 + $0x2a0] sm:$0xff]  ;;  %v105_v41 = vld [vmem:[%s865_s1 + $0x2a8] sm:$0xff] }
  0x19   :  { %436 = vmatpush3.bf16.msra.mxu1 %v435_v54  ;;  %492 = vmatprep.subr.bf16.mxu0 %v523_v3  ;;  %v457_v42 = vpack.c.bf16 %v75_v37, %v74_v36  ;;  %v58_v43 = vld [vmem:[%s865_s1 + $0x130] sm:$0xff]  ;;  %v59_v44 = vld [vmem:[%s865_s1 + $0x138] sm:$0xff]  ;;  %v76_v45 = vld [vmem:[%s865_s1 + $0x1c0] sm:$0xff]  ;;  %v508_v47 = vpack.c.bf16 %v105_v41, %v104_v40 }
  0x1a   :  { %438 = vmatprep.subr.bf16.mxu1 %v437_v57  ;;  %v77_v46 = vld [vmem:[%s865_s1 + $0x1c8] sm:$0xff]  ;;  %v459_v48 = vpack.c.bf16 %v59_v44, %v58_v43  ;;  %v106_v49 = vld [vmem:[%s865_s1 + $0x2b0] sm:$0xff]  ;;  %v107_v50 = vld [vmem:[%s865_s1 + $0x2b8] sm:$0xff] }
  0x1b   :  { %v461_v51 = vpack.c.bf16 %v77_v46, %v76_v45  ;;  %v60_v52 = vld [vmem:[%s865_s1 + $0x140] sm:$0xff]  ;;  %v61_v53 = vld [vmem:[%s865_s1 + $0x148] sm:$0xff]  ;;  %v78_v54 = vld [vmem:[%s865_s1 + $0x1d0] sm:$0xff]  ;;  %v511_v56 = vpack.c.bf16 %v107_v50, %v106_v49 }
  0x1c   :  { %494 = vmatpush1.bf16.msra.mxu0 %v493_v62  ;;  %v79_v55 = vld [vmem:[%s865_s1 + $0x1d8] sm:$0xff]  ;;  %v463_v57 = vpack.c.bf16 %v61_v53, %v60_v52  ;;  %v108_v58 = vld [vmem:[%s865_s1 + $0x2c0] sm:$0xff]  ;;  %v109_v59 = vld [vmem:[%s865_s1 + $0x2c8] sm:$0xff] }
  0x1d   :  { %440 = vmatpush3.bf16.msra.mxu1 %v439_v63  ;;  %495 = vmatprep.subr.bf16.mxu0 %v523_v3  ;;  %v465_v60 = vpack.c.bf16 %v79_v55, %v78_v54  ;;  %v62_v61 = vld [vmem:[%s865_s1 + $0x150] sm:$0xff]  ;;  %v63_v62 = vld [vmem:[%s865_s1 + $0x158] sm:$0xff]  ;;  %v80_v63 = vld [vmem:[%s865_s1 + $0x1e0] sm:$0xff]  ;;  %v514_v1 = vpack.c.bf16 %v109_v59, %v108_v58 }
  0x1e   :  { %442 = vmatprep.subr.bf16.mxu1 %v441_v2  ;;  %v81_v0 = vld [vmem:[%s865_s1 + $0x1e8] sm:$0xff]  ;;  %v467_v2 = vpack.c.bf16 %v63_v62, %v62_v61  ;;  %v110_v4 = vld [vmem:[%s865_s1 + $0x2d0] sm:$0xff]  ;;  %v111_v5 = vld [vmem:[%s865_s1 + $0x2d8] sm:$0xff] }
  0x1f   :  { %v469_v6 = vpack.c.bf16 %v81_v0, %v80_v63  ;;  %v64_v7 = vld [vmem:[%s865_s1 + $0x160] sm:$0xff]  ;;  %v83_v10 = vld [vmem:[%s865_s1 + $0x1f8] sm:$0xff]  ;;  %v517_v11 = vpack.c.bf16 %v111_v5, %v110_v4  ;;  %v113_v14 = vld [vmem:[%s865_s1 + $0x2e8] sm:$0xff] }
  0x20   :  { %497 = vmatpush1.bf16.msra.mxu0 %v496_v8  ;;  %v65_v8 = vld [vmem:[%s865_s1 + $0x168] sm:$0xff]  ;;  %v112_v13 = vld [vmem:[%s865_s1 + $0x2e0] sm:$0xff]  ;;  %v66_v16 = vld [vmem:[%s865_s1 + $0x170] sm:$0xff] }
  0x21   :  { %444 = vmatpush3.bf16.msra.mxu1 %v443_v9  ;;  %498 = vmatprep.subr.bf16.mxu0 %v523_v3  ;;  %v82_v9 = vld [vmem:[%s865_s1 + $0x1f0] sm:$0xff]  ;;  %v18_v20 = vld [vmem:[%s866_s0 + $0x20] sm:$0xff] }
  0x22   :  { %446 = vmatprep.subr.bf16.mxu1 %v445_v12  ;;  %v471_v12 = vpack.c.bf16 %v65_v8, %v64_v7  ;;  %v473_v15 = vpack.c.bf16 %v83_v10, %v82_v9  ;;  %v16_v21 = vld [vmem:[%s866_s0 + $0x10] sm:$0xff] }
  0x24   :  { %190 = vmatmul.mubr.f32.vlgmr.msra.gmra.mrb[0].mxu1 %v14_v17  ;;  %500 = vmatpush1.bf16.msra.mxu0 %v499_v18  ;;  %v67_v17 = vld [vmem:[%s865_s1 + $0x178] sm:$0xff]  ;;  %v520_v18 = vpack.c.bf16 %v113_v14, %v112_v13 }
  0x25   :  { %448 = vmatpush3.bf16.msra.mxu1 %v447_v19  ;;  %501 = vmatprep.subr.bf16.mxu0 %v523_v3  ;;  %v475_v19 = vpack.c.bf16 %v67_v17, %v66_v16 }
  0x26   :  { %450 = vmatprep.subr.bf16.mxu1 %v449_v23  ;;  %259 = vmatprep.mubr.f32.mxu1 %v17_v28 }
  0x28   :  { %503 = vmatpush1.bf16.msra.mxu0 %v502_v29 }
  0x29   :  { %452 = vmatpush3.bf16.msra.mxu1 %v451_v30  ;;  %504 = vmatprep.subr.bf16.mxu0 %v523_v3 }
  0x2a   :  { %454 = vmatprep.subr.bf16.mxu1 %v453_v33 }
  0x2c   :  { %506 = vmatpush1.bf16.msra.mxu0 %v505_v38 }
  0x2d   :  { %456 = vmatpush3.bf16.msra.mxu1 %v455_v39  ;;  %507 = vmatprep.subr.bf16.mxu0 %v523_v3 }
  0x2e   :  { %458 = vmatprep.subr.bf16.mxu1 %v457_v42 }
  0x30   :  { %509 = vmatpush1.bf16.msra.mxu0 %v508_v47 }
  0x31   :  { %460 = vmatpush3.bf16.msra.mxu1 %v459_v48  ;;  %510 = vmatprep.subr.bf16.mxu0 %v523_v3 }
  0x32   :  { %462 = vmatprep.subr.bf16.mxu1 %v461_v51 }
  0x34   :  { %512 = vmatpush1.bf16.msra.mxu0 %v511_v56 }
  0x35   :  { %464 = vmatpush3.bf16.msra.mxu1 %v463_v57  ;;  %513 = vmatprep.subr.bf16.mxu0 %v523_v3 }
  0x36   :  { %466 = vmatprep.subr.bf16.mxu1 %v465_v60 }
  0x38   :  { %515 = vmatpush1.bf16.msra.mxu0 %v514_v1 }
  0x39   :  { %468 = vmatpush3.bf16.msra.mxu1 %v467_v2  ;;  %516 = vmatprep.subr.bf16.mxu0 %v523_v3 }
  0x3a   :  { %470 = vmatprep.subr.bf16.mxu1 %v469_v6 }
  0x3c   :  { %518 = vmatpush1.bf16.msra.mxu0 %v517_v11 }
  0x3d   :  { %472 = vmatpush3.bf16.msra.mxu1 %v471_v12  ;;  %519 = vmatprep.subr.bf16.mxu0 %v523_v3  ;;  %v341_v3 = vld [vmem:[%s867_s2] ss:$0 sm:$0xff] }
  0x3e   :  { %474 = vmatprep.subr.bf16.mxu1 %v473_v15 }
  0x40   :  { %521 = vmatpush1.bf16.msra.mxu0 %v520_v18 }
  0x41   :  { %476 = vmatpush3.bf16.msra.mxu1 %v475_v19 }
  0x43   :  { %330 = vmatmul.mubr.f32.vlgmr.msra.gmra.mrb[0].mxu0 %v18_v20 }
  0x44   :  { %260 = vmatmul.mubr.f32.vlgmr.msra.gmra.mrb[2].mxu1 %v16_v21 }
  0xf7   :  { %v375_v22 = vpop.f32.mrb[0].mxu1 }
  0xf8   :  { %v376_v23 = vpop.f32.mrb[1].mxu1 }
  0xf9   :  { %v377_v24 = vadd.f32 %v376_v23, %v375_v22 }
  0xfb   :  { %v192_v29 = vadd.f32 %v377_v24, %v341_v3 }
 0x116   :  { %v331_v25 = vpop.f32.mrb[0].mxu0 }
 0x117   :  { %v410_v26 = vpop.f32.mrb[2].mxu1  ;;  %v333_v27 = vpop.f32.mrb[1].mxu0 }
 0x118   :  { %v411_v28 = vpop.f32.mrb[3].mxu1 }
 0x119   :  { %v412_v30 = vadd.f32 %v411_v28, %v410_v26 }
 0x11b   :  { %v262_v31 = vadd.f32 %v412_v30, %v192_v29 }
 0x11d   :  { %v332_v32 = vadd.f32 %v331_v25, %v262_v31 }
 0x11f   :  { %336 = vst.msk [vmem:[%s868_s3] sm:$0xff] %vm335_vm1, %v332_v32 }

</bundles_post_ra>
